<compile_context>
chip_gen: v7x
topology: tpu7x:2x2x1
jax: 0.10.0
libtpu: 0.0.40
codegen_flags: <defaults>
</compile_context>

<pallas_src>
import jax
import jax.numpy as jnp
import numpy as np
from jax.experimental import pallas as pl
from jax.experimental.pallas import tpu as pltpu


def endo_impact_kernel(cjs_ref, ti_ref, tjs_ref, w_phi_ref, w_int_ref, delta_ref,
                       phi_ref, pHi_ref):
    """One batch tile (TB lanes): phi_all[c, b] and pHi[c, b] for every event type c."""
    cjs = cjs_ref[...]            # (Mem, TB) int32  history event types (pad rows == C)
    tjs = tjs_ref[...]            # (Mem, TB) f32    history event times
    ti = ti_ref[...]              # (1, TB)   f32    current event time

    Mem, TB = tjs.shape
    C = phi_ref.shape[0]
    M = delta_ref.shape[0]

    dts = ti - tjs                                   # (Mem, TB)  t_i - t_j
    # TODO(synk): PyTorch's `history_time[:, -1].repeat(1, mem)` is shape-buggy for
    # batch > 1; we implement the intended per-sample semantics (matches the reference).
    t_start = tjs[Mem - 1:Mem, :] - tjs              # (Mem, TB)  anchor = last history time
    ts_start = jnp.maximum(t_start, 0.0)
    ts_stop = jnp.maximum(dts, 0.0)
    pos = dts >= 0.0                                 # causal mask for the kernel values

    # History-type mask shared by every base and both paths (no f32 one-hot).
    # Padded memory rows carry cjs == C and match nothing -> contribute exactly 0.
    c_iota = jax.lax.broadcasted_iota(jnp.int32, (C, Mem, TB), 0)
    mask3 = cjs[None, :, :] == c_iota                # (C, Mem, TB) bool

    # Two stacked, fully lane-dense exponentials for all M bases.
    e_stop = jnp.exp(jnp.stack([-delta_ref[m] * ts_stop for m in range(M)], axis=0))
    e_start = jnp.exp(jnp.stack([-delta_ref[m] * ts_start for m in range(M)], axis=0))
    gt_vals = jnp.where(pos[None], e_stop, 0.0)      # (M, Mem, TB)  delta_m folded in W
    Gt_vals = e_start - e_stop                       # (M, Mem, TB)

    # Masked per-(base, history-type, memory-slot) values.  The reshape only merges
    # leading dims (Mem is a multiple of 8 -> tile-aligned), i.e. pure relabeling.
    r_gt = jnp.where(mask3[None], gt_vals[:, None], 0.0).reshape(M * C * Mem, TB)
    r_Gt = jnp.where(mask3[None], Gt_vals[:, None], 0.0).reshape(M * C * Mem, TB)

    # Fused MXU dots: each one performs the history-type gather, the memory-axis
    # reduction and the (C, C) mix in a single K = M*C*Mem contraction.
    phi_ref[...] = jnp.dot(w_phi_ref[...], r_gt, preferred_element_type=jnp.float32)
    pHi_ref[...] = jnp.dot(w_int_ref[...], r_Gt, preferred_element_type=jnp.float32)


def _round_up(x, n):
    return ((x + n - 1) // n) * n


def endogenous_impact_forward(ci, cjs, ti, tjs, W, delta, *, batch_tile=1024):
    """phi_c (B, 1), pHi (B, C) — same semantics as BasicEndogenousImpact.forward."""
    B, Mem = cjs.shape
    M, C, _ = W.shape

    # --- weights: fold delta_m into the phi table, then repeat each (m, c_hist) column
    #     Mem_p times so the in-kernel dot also sums over history positions.
    Mem_p = _round_up(Mem, 8)                        # tile-aligned memory axis
    W_phi = W * delta[:, None, None]                 # kernel_m(t) = delta_m * exp(-delta_m t)
    # kernel RHS row order: r = (m*C + c_hist) * Mem_p + j
    w_phi_rep = jnp.repeat(jnp.transpose(W_phi, (1, 0, 2)).reshape(C, M * C), Mem_p, axis=1)
    w_int_rep = jnp.repeat(jnp.transpose(W, (1, 0, 2)).reshape(C, M * C), Mem_p, axis=1)
    K = M * C * Mem_p

    # --- batch-on-lanes input layout (lane axis = batch).
    cjs_t = jnp.transpose(cjs).astype(jnp.int32)     # (Mem, B)
    tjs_t = jnp.transpose(tjs).astype(jnp.float32)   # (Mem, B)
    ti_t = jnp.reshape(ti, (1, B)).astype(jnp.float32)

    # Pad the memory axis to a multiple of 8 sublanes.  Padded rows get the
    # out-of-range type id C (match no mask -> contribute 0); tjs is edge-padded so the
    # last row keeps the true "last history timestamp" anchor used for t_start.
    if Mem_p != Mem:
        cjs_t = jnp.pad(cjs_t, ((0, Mem_p - Mem), (0, 0)), constant_values=C)
        tjs_t = jnp.pad(tjs_t, ((0, Mem_p - Mem), (0, 0)), mode="edge")

    # Batch tile: multiple of 128 lanes; cap so the grid keeps >= 2 steps when the batch
    # allows it (v7x: the "parallel" axis can then shard across both TensorCores).
    Bp128 = _round_up(max(B, 1), 128)
    TB = min(_round_up(batch_tile, 128), Bp128)
    if Bp128 > 128 and TB >= Bp128:
        TB = _round_up((Bp128 + 1) // 2, 128)
    Bp = _round_up(B, TB)
    if Bp != B:
        pad = Bp - B
        cjs_t = jnp.pad(cjs_t, ((0, 0), (0, pad)))
        tjs_t = jnp.pad(tjs_t, ((0, 0), (0, pad)))
        ti_t = jnp.pad(ti_t, ((0, 0), (0, pad)))
    grid = (Bp // TB,)

    phi_all_t, pHi_t = pl.pallas_call(
        endo_impact_kernel,
        out_shape=(jax.ShapeDtypeStruct((C, Bp), jnp.float32),
                   jax.ShapeDtypeStruct((C, Bp), jnp.float32)),
        grid=grid,
        in_specs=[
            pl.BlockSpec((Mem_p, TB), lambda b: (0, b)),         # cjs tile
            pl.BlockSpec((1, TB), lambda b: (0, b)),             # ti tile
            pl.BlockSpec((Mem_p, TB), lambda b: (0, b)),         # tjs tile
            pl.BlockSpec((C, K), lambda b: (0, 0)),              # phi weights (resident)
            pl.BlockSpec((C, K), lambda b: (0, 0)),              # int weights (resident)
            pl.BlockSpec(memory_space=pltpu.MemorySpace.SMEM),   # delta scalars
        ],
        out_specs=(
            pl.BlockSpec((C, TB), lambda b: (0, b)),             # phi for all event types
            pl.BlockSpec((C, TB), lambda b: (0, b)),             # pHi
        ),
        compiler_params=pltpu.CompilerParams(
            dimension_semantics=("parallel",),                   # batch shards across TCs
        ),
    )(cjs_t, ti_t, tjs_t, w_phi_rep, w_int_rep, delta)

    phi_all = jnp.transpose(phi_all_t[:, :B])                    # (B, C)
    pHi = jnp.transpose(pHi_t[:, :B])                            # (B, C)
    # phi_c[b] = phi_all[b, ci[b]]: tiny gather done outside the kernel so the Pallas
    # output store stays lane-dense instead of a (B, 1) masked store.
    phi_c = jnp.take_along_axis(phi_all, ci, axis=1)
    return phi_c, pHi


def reference_forward(ci, cjs, ti, tjs, W, delta):
    """Pure-JAX reference with identical semantics."""
    dts = ti - tjs
    t_start = tjs[:, -1:] - tjs
    ts_start = jnp.maximum(t_start, 0.0)[..., None]
    ts_stop = jnp.maximum(dts, 0.0)[..., None]
    gt = jnp.where(dts[..., None] >= 0.0,
                   delta * jnp.exp(-delta * ts_stop), 0.0)          # (B, Mem, M)
    Gt = jnp.exp(-delta * ts_start) - jnp.exp(-delta * ts_stop)     # (B, Mem, M)
    Wh = W[:, :, cjs]                                               # (M, C, B, Mem)
    pHi = jnp.einsum('mcbj,bjm->bc', Wh, Gt)
    phi_all = jnp.einsum('mcbj,bjm->bc', Wh, gt)
    phi = jnp.take_along_axis(phi_all, ci, axis=1)
    return phi, pHi


def _make_inputs(key, B, Mem, C, M):
    k_w, k_ci, k_cjs, k_dt, k_lead = jax.random.split(key, 5)
    # Embedding weights: uniform(0.01/C, 1/C), stacked (M, C, C), W[m, c_event, c_history].
    W = jax.random.uniform(k_w, (M, C, C), jnp.float32, minval=0.01 / C, maxval=1.0 / C)
    ci = jax.random.randint(k_ci, (B, 1), 1, C, dtype=jnp.int32)
    cjs = jax.random.randint(k_cjs, (B, Mem), 0, C, dtype=jnp.int32)
    # increasing history timestamps; the current event occurs after the last history event
    tjs = jnp.cumsum(jax.random.uniform(k_dt, (B, Mem), jnp.float32, 0.1, 1.0), axis=1)
    ti = tjs[:, -1:] + jax.random.uniform(k_lead, (B, 1), jnp.float32, 0.1, 1.0)
    return W, ci, cjs, ti, tjs


if __name__ == "__main__":
    key = jax.random.PRNGKey(0)
    # Deterministic exponential decay-kernel rates (decay_kernel.parameters[1] == M bases).
    delta = jnp.array([0.5, 1.0, 2.0], jnp.float32)
    M = delta.shape[0]

    # --- test 1: small shapes from the module spec (batch=16, memory=8, num_type=5).
    k1, k2 = jax.random.split(key)
    B, Mem, C = 16, 8, 5
    W, ci, cjs, ti, tjs = _make_inputs(k1, B, Mem, C, M)
    phi_c, pHi = endogenous_impact_forward(ci, cjs, ti, tjs, W, delta)
    jax.block_until_ready((phi_c, pHi))
    phi_ref, pHi_ref = reference_forward(ci, cjs, ti, tjs, W, delta)
    np.testing.assert_allclose(np.asarray(phi_c), np.asarray(phi_ref), rtol=1e-5, atol=1e-5)
    np.testing.assert_allclose(np.asarray(pHi), np.asarray(pHi_ref), rtol=1e-5, atol=1e-5)
    assert phi_c.shape == (B, 1) and pHi.shape == (B, C)

    # --- test 2: larger batch with an odd memory size: exercises memory-axis padding,
    #     batch padding, the >=2-step grid split and the pipelined "parallel" axis.
    B2, Mem2 = 300, 11
    W2, ci2, cjs2, ti2, tjs2 = _make_inputs(k2, B2, Mem2, C, M)
    phi_c2, pHi2 = endogenous_impact_forward(ci2, cjs2, ti2, tjs2, W2, delta,
                                             batch_tile=1024)
    jax.block_until_ready((phi_c2, pHi2))
    phi_ref2, pHi_ref2 = reference_forward(ci2, cjs2, ti2, tjs2, W2, delta)
    np.testing.assert_allclose(np.asarray(phi_c2), np.asarray(phi_ref2), rtol=1e-5, atol=1e-5)
    np.testing.assert_allclose(np.asarray(pHi2), np.asarray(pHi_ref2), rtol=1e-5, atol=1e-5)
    assert phi_c2.shape == (B2, 1) and pHi2.shape == (B2, C)

    print("KERNEL_OK")
</pallas_src>

<mosaic_0001>
module attributes {stable_mosaic.version = 11 : i64} {
  func.func @endo_impact_kernel(%arg0: i32, %arg1: memref<8x128xi32, #tpu.memory_space<vmem>>, %arg2: memref<1x128xf32, #tpu.memory_space<vmem>>, %arg3: memref<8x128xf32, #tpu.memory_space<vmem>>, %arg4: memref<5x120xf32, #tpu.memory_space<vmem>>, %arg5: memref<5x120xf32, #tpu.memory_space<vmem>>, %arg6: memref<3xf32, #tpu.memory_space<smem>>, %arg7: memref<5x128xf32, #tpu.memory_space<vmem>>, %arg8: memref<5x128xf32, #tpu.memory_space<vmem>>) attributes {dimension_semantics = [#tpu.dimension_semantics<parallel>], iteration_bounds = array<i64: 1>, scalar_prefetch = 0 : i64, scratch_operands = 0 : i64, tpu.core_type = #tpu.core_type<tc>, window_params = [{transform_indices = @transform_0, window_bounds = array<i64: 8, 128>}, {transform_indices = @transform_1, window_bounds = array<i64: 1, 128>}, {transform_indices = @transform_2, window_bounds = array<i64: 8, 128>}, {pipeline_mode = #tpu.pipeline_mode<synchronous>, transform_indices = @transform_3, window_bounds = array<i64: 5, 120>}, {pipeline_mode = #tpu.pipeline_mode<synchronous>, transform_indices = @transform_4, window_bounds = array<i64: 5, 120>}, {transform_indices = @transform_5, window_bounds = array<i64: 3>}, {transform_indices = @transform_6, window_bounds = array<i64: 5, 128>}, {transform_indices = @transform_7, window_bounds = array<i64: 5, 128>}]} {
    %c0 = arith.constant 0 : index
    %c0_0 = arith.constant 0 : index
    %0 = vector.load %arg1[%c0, %c0_0] : memref<8x128xi32, #tpu.memory_space<vmem>>, vector<8x128xi32>
    %c0_1 = arith.constant 0 : index
    %c0_2 = arith.constant 0 : index
    %1 = vector.load %arg3[%c0_1, %c0_2] : memref<8x128xf32, #tpu.memory_space<vmem>>, vector<8x128xf32>
    %c0_3 = arith.constant 0 : index
    %c0_4 = arith.constant 0 : index
    %2 = vector.load %arg2[%c0_3, %c0_4] : memref<1x128xf32, #tpu.memory_space<vmem>>, vector<1x128xf32>
    %3 = vector.broadcast %2 : vector<1x128xf32> to vector<8x128xf32>
    %4 = arith.subf %3, %1 : vector<8x128xf32>
    %5 = vector.extract_strided_slice %1 {offsets = [7, 0], sizes = [1, 128], strides = [1, 1]} : vector<8x128xf32> to vector<1x128xf32>
    %6 = vector.broadcast %5 : vector<1x128xf32> to vector<8x128xf32>
    %7 = arith.subf %6, %1 : vector<8x128xf32>
    %cst = arith.constant 0.000000e+00 : f32
    %8 = vector.broadcast %cst : f32 to vector<8x128xf32>
    %9 = arith.maximumf %7, %8 : vector<8x128xf32>
    %cst_5 = arith.constant 0.000000e+00 : f32
    %10 = vector.broadcast %cst_5 : f32 to vector<8x128xf32>
    %11 = arith.maximumf %4, %10 : vector<8x128xf32>
    %cst_6 = arith.constant 0.000000e+00 : f32
    %12 = vector.broadcast %cst_6 : f32 to vector<8x128xf32>
    %13 = arith.cmpf oge, %4, %12 : vector<8x128xf32>
    %14 = tpu.iota {dimensions = array<i32: 0>} : vector<5x8x128xi32>
    %15 = vector.shape_cast %0 : vector<8x128xi32> to vector<1x8x128xi32>
    %16 = vector.broadcast %15 : vector<1x8x128xi32> to vector<5x8x128xi32>
    %17 = arith.cmpi eq, %16, %14 : vector<5x8x128xi32>
    %c0_7 = arith.constant 0 : index
    %18 = memref.load %arg6[%c0_7] : memref<3xf32, #tpu.memory_space<smem>>
    %cst_8 = arith.constant 0.000000e+00 : f32
    %19 = arith.subf %cst_8, %18 : f32
    %20 = vector.broadcast %19 : f32 to vector<8x128xf32>
    %21 = arith.mulf %20, %11 : vector<8x128xf32>
    %c1 = arith.constant 1 : index
    %22 = memref.load %arg6[%c1] : memref<3xf32, #tpu.memory_space<smem>>
    %cst_9 = arith.constant 0.000000e+00 : f32
    %23 = arith.subf %cst_9, %22 : f32
    %24 = vector.broadcast %23 : f32 to vector<8x128xf32>
    %25 = arith.mulf %24, %11 : vector<8x128xf32>
    %c2 = arith.constant 2 : index
    %26 = memref.load %arg6[%c2] : memref<3xf32, #tpu.memory_space<smem>>
    %cst_10 = arith.constant 0.000000e+00 : f32
    %27 = arith.subf %cst_10, %26 : f32
    %28 = vector.broadcast %27 : f32 to vector<8x128xf32>
    %29 = arith.mulf %28, %11 : vector<8x128xf32>
    %30 = vector.shape_cast %21 : vector<8x128xf32> to vector<1x8x128xf32>
    %31 = vector.shape_cast %25 : vector<8x128xf32> to vector<1x8x128xf32>
    %32 = vector.shape_cast %29 : vector<8x128xf32> to vector<1x8x128xf32>
    %33 = tpu.concatenate %30, %31, %32 in 0 : vector<1x8x128xf32>, vector<1x8x128xf32>, vector<1x8x128xf32> -> vector<3x8x128xf32>
    %34 = math.exp %33 : vector<3x8x128xf32>
    %c0_11 = arith.constant 0 : index
    %35 = memref.load %arg6[%c0_11] : memref<3xf32, #tpu.memory_space<smem>>
    %cst_12 = arith.constant 0.000000e+00 : f32
    %36 = arith.subf %cst_12, %35 : f32
    %37 = vector.broadcast %36 : f32 to vector<8x128xf32>
    %38 = arith.mulf %37, %9 : vector<8x128xf32>
    %c1_13 = arith.constant 1 : index
    %39 = memref.load %arg6[%c1_13] : memref<3xf32, #tpu.memory_space<smem>>
    %cst_14 = arith.constant 0.000000e+00 : f32
    %40 = arith.subf %cst_14, %39 : f32
    %41 = vector.broadcast %40 : f32 to vector<8x128xf32>
    %42 = arith.mulf %41, %9 : vector<8x128xf32>
    %c2_15 = arith.constant 2 : index
    %43 = memref.load %arg6[%c2_15] : memref<3xf32, #tpu.memory_space<smem>>
    %cst_16 = arith.constant 0.000000e+00 : f32
    %44 = arith.subf %cst_16, %43 : f32
    %45 = vector.broadcast %44 : f32 to vector<8x128xf32>
    %46 = arith.mulf %45, %9 : vector<8x128xf32>
    %47 = vector.shape_cast %38 : vector<8x128xf32> to vector<1x8x128xf32>
    %48 = vector.shape_cast %42 : vector<8x128xf32> to vector<1x8x128xf32>
    %49 = vector.shape_cast %46 : vector<8x128xf32> to vector<1x8x128xf32>
    %50 = tpu.concatenate %47, %48, %49 in 0 : vector<1x8x128xf32>, vector<1x8x128xf32>, vector<1x8x128xf32> -> vector<3x8x128xf32>
    %51 = math.exp %50 : vector<3x8x128xf32>
    %52 = vector.shape_cast %13 : vector<8x128xi1> to vector<1x8x128xi1>
    %cst_17 = arith.constant 0.000000e+00 : f32
    %53 = vector.shape_cast %52 : vector<1x8x128xi1> to vector<1x8x128xi1>
    %54 = vector.broadcast %53 : vector<1x8x128xi1> to vector<3x8x128xi1>
    %55 = vector.broadcast %cst_17 : f32 to vector<3x8x128xf32>
    %56 = arith.select %54, %34, %55 : vector<3x8x128xi1>, vector<3x8x128xf32>
    %57 = arith.subf %51, %34 : vector<3x8x128xf32>
    %58 = vector.shape_cast %17 : vector<5x8x128xi1> to vector<1x5x8x128xi1>
    %59 = vector.shape_cast %56 : vector<3x8x128xf32> to vector<3x1x8x128xf32>
    %cst_18 = arith.constant 0.000000e+00 : f32
    %60 = vector.shape_cast %58 : vector<1x5x8x128xi1> to vector<1x5x8x128xi1>
    %61 = vector.broadcast %60 : vector<1x5x8x128xi1> to vector<3x5x8x128xi1>
    %62 = vector.shape_cast %59 : vector<3x1x8x128xf32> to vector<3x1x8x128xf32>
    %63 = vector.broadcast %62 : vector<3x1x8x128xf32> to vector<3x5x8x128xf32>
    %64 = vector.broadcast %cst_18 : f32 to vector<3x5x8x128xf32>
    %65 = arith.select %61, %63, %64 : vector<3x5x8x128xi1>, vector<3x5x8x128xf32>
    %66 = vector.shape_cast %65 : vector<3x5x8x128xf32> to vector<120x128xf32>
    %67 = vector.shape_cast %17 : vector<5x8x128xi1> to vector<1x5x8x128xi1>
    %68 = vector.shape_cast %57 : vector<3x8x128xf32> to vector<3x1x8x128xf32>
    %cst_19 = arith.constant 0.000000e+00 : f32
    %69 = vector.shape_cast %67 : vector<1x5x8x128xi1> to vector<1x5x8x128xi1>
    %70 = vector.broadcast %69 : vector<1x5x8x128xi1> to vector<3x5x8x128xi1>
    %71 = vector.shape_cast %68 : vector<3x1x8x128xf32> to vector<3x1x8x128xf32>
    %72 = vector.broadcast %71 : vector<3x1x8x128xf32> to vector<3x5x8x128xf32>
    %73 = vector.broadcast %cst_19 : f32 to vector<3x5x8x128xf32>
    %74 = arith.select %70, %72, %73 : vector<3x5x8x128xi1>, vector<3x5x8x128xf32>
    %75 = vector.shape_cast %74 : vector<3x5x8x128xf32> to vector<120x128xf32>
    %c0_20 = arith.constant 0 : index
    %c0_21 = arith.constant 0 : index
    %76 = vector.load %arg4[%c0_20, %c0_21] : memref<5x120xf32, #tpu.memory_space<vmem>>, vector<5x120xf32>
    %cst_22 = arith.constant dense<0.000000e+00> : vector<5x128xf32>
    %77 = tpu.matmul %76, %66, %cst_22 {dimension_numbers = #tpu.dot_dimension_numbers<[1], [0], [0], [1], [0, 0, 1, 1], [], []>} : vector<5x120xf32>, vector<120x128xf32>, vector<5x128xf32> -> vector<5x128xf32>
    %c0_23 = arith.constant 0 : index
    %c0_24 = arith.constant 0 : index
    %78 = vector.load %arg7[%c0_23, %c0_24] : memref<5x128xf32, #tpu.memory_space<vmem>>, vector<5x128xf32>
    tpu.vector_store %arg7[%c0_23, %c0_24], %77 {strides = array<i32>} : memref<5x128xf32, #tpu.memory_space<vmem>>, vector<5x128xf32>,
    %c0_25 = arith.constant 0 : index
    %c0_26 = arith.constant 0 : index
    %79 = vector.load %arg5[%c0_25, %c0_26] : memref<5x120xf32, #tpu.memory_space<vmem>>, vector<5x120xf32>
    %cst_27 = arith.constant dense<0.000000e+00> : vector<5x128xf32>
    %80 = tpu.matmul %79, %75, %cst_27 {dimension_numbers = #tpu.dot_dimension_numbers<[1], [0], [0], [1], [0, 0, 1, 1], [], []>} : vector<5x120xf32>, vector<120x128xf32>, vector<5x128xf32> -> vector<5x128xf32>
    %c0_28 = arith.constant 0 : index
    %c0_29 = arith.constant 0 : index
    %81 = vector.load %arg8[%c0_28, %c0_29] : memref<5x128xf32, #tpu.memory_space<vmem>>, vector<5x128xf32>
    tpu.vector_store %arg8[%c0_28, %c0_29], %80 {strides = array<i32>} : memref<5x128xf32, #tpu.memory_space<vmem>>, vector<5x128xf32>,
    return
  }
  func.func @transform_0(%arg0: i32) -> (i32, i32) {
    %c0_i32 = arith.constant 0 : i32
    %c0_i32_0 = arith.constant 0 : i32
    return %c0_i32, %arg0 : i32, i32
  }
  func.func @transform_1(%arg0: i32) -> (i32, i32) {
    %c0_i32 = arith.constant 0 : i32
    %c0_i32_0 = arith.constant 0 : i32
    return %c0_i32, %arg0 : i32, i32
  }
  func.func @transform_2(%arg0: i32) -> (i32, i32) {
    %c0_i32 = arith.constant 0 : i32
    %c0_i32_0 = arith.constant 0 : i32
    return %c0_i32, %arg0 : i32, i32
  }
  func.func @transform_3(%arg0: i32) -> (i32, i32) {
    %c0_i32 = arith.constant 0 : i32
    %c0_i32_0 = arith.constant 0 : i32
    %c0_i32_1 = arith.constant 0 : i32
    return %c0_i32, %c0_i32_0 : i32, i32
  }
  func.func @transform_4(%arg0: i32) -> (i32, i32) {
    %c0_i32 = arith.constant 0 : i32
    %c0_i32_0 = arith.constant 0 : i32
    %c0_i32_1 = arith.constant 0 : i32
    return %c0_i32, %c0_i32_0 : i32, i32
  }
  func.func @transform_5(%arg0: i32) -> i32 {
    %c0_i32 = arith.constant 0 : i32
    %c0_i32_0 = arith.constant 0 : i32
    return %c0_i32 : i32
  }
  func.func @transform_6(%arg0: i32) -> (i32, i32) {
    %c0_i32 = arith.constant 0 : i32
    %c0_i32_0 = arith.constant 0 : i32
    return %c0_i32, %arg0 : i32, i32
  }
  func.func @transform_7(%arg0: i32) -> (i32, i32) {
    %c0_i32 = arith.constant 0 : i32
    %c0_i32_0 = arith.constant 0 : i32
    return %c0_i32, %arg0 : i32, i32
  }
}

</mosaic_0001>

<bundles_post_ra>
// kernel: tpu_custom_call.1
= control target key start
LH: loop header
LB: loop body
LE: loop exit
PB: predicated region body
PF: predicated region fallthrough
CT: control target
= control target key end

     0   :  { %13 = vsyncpa [#allocation3], 0  ;;  %s914_s0 = inlined_call_operand.hbm [shape: s32[8,128], index: 0, kind: input, shape index: {}]   ;;  %s915_s1 = inlined_call_operand.vmem [shape: f32[1,128], index: 1, kind: input, shape index: {}]   ;;  %s916_s2 = inlined_call_operand.hbm [shape: f32[8,128], index: 2, kind: input, shape index: {}]   ;;  %s917_s3 = inlined_call_operand.vmem [shape: f32[5,120], index: 3, kind: input, shape index: {}]   ;;  %s918_s4 = inlined_call_operand.hbm [shape: f32[5,120], index: 4, kind: input, shape index: {}]   ;;  %s919_s5 = inlined_call_operand.vmem [shape: f32[3], index: 5, kind: input, shape index: {}]   ;;  %s920_s6 = inlined_call_operand.hbm [shape: f32[5,128], index: 6, kind: output, shape index: {0}]   ;;  %s921_s7 = inlined_call_operand.hbm [shape: f32[5,128], index: 7, kind: output, shape index: {1}]  }
   0x1   :  { %14 = vsyncpa [#allocation7], 0 }
   0x2   :  { %15 = vsyncpa [#allocation5], 0 }
   0x3   :  { %16 = vsyncpa [#allocation4], 0 }
   0x4   :  { %17 = vsyncpa [#allocation12], 0  ;;  %s697_s24 = smov [#allocation6]   ;;  %s698_s26 = smov [#allocation2]  }
   0x5   :  { %s36_s25 = sshll.u32 %s697_s24, 4  ;;  %s24_s27 = sshll.u32 %s698_s26, 4  ;;  %s37_s25 = int_to_ptr.vmem [resolvable:$true] %s36_s25  ;;  %s25_s27 = int_to_ptr.vmem [resolvable:$true] %s24_s27 }
   0x6   :  { %s565_s30 = scalar_lea.hbm %s916_s2, 128 }
   0x7   :  { %p566_p0 = scmp.ne.s32.totalorder %s916_s2, %s565_s30  ;;  %p569_p1 = scmp.lt.u32.totalorder %s565_s30, %s916_s2 }
   0x9   :  { %p571_p2 = pnand %p569_p1, %p566_p0 }
   0xb   :  { %574 = shalt.err (!%p571_p2)
}
   0xc   :  { %s575_s12 = scalar_lea.vmem %s37_s25, 128  ;;  %p580_p4 = scmp.lt.s32.totalorder %s37_s25, %s37_s25 }
   0xd   :  { %p576_p3 = scmp.ne.s32.totalorder %s37_s25, %s575_s12  ;;  %p581_p5 = scmp.lt.s32.totalorder %s575_s12, %s575_s12 }
   0xf   :  { %p582_p6 = por %p581_p5, %p580_p4 }
  0x11   :  { %p583_p7 = pnand %p582_p6, %p576_p3 }
  0x13   :  { %586 = shalt.err (!%p583_p7)
}
  0x14   :  { %39 = dma.hbm_to_vmem [thread:$0]  %s916_s2, 128, %s37_s25, [#allocation7]  }
  0x15   :  { %s587_s17 = scalar_lea.hbm %s914_s0, 128 }
  0x16   :  { %p588_p8 = scmp.ne.s32.totalorder %s914_s0, %s587_s17  ;;  %p591_p9 = scmp.lt.u32.totalorder %s587_s17, %s914_s0 }
  0x18   :  { %p593_p10 = pnand %p591_p9, %p588_p8 }
  0x1a   :  { %596 = shalt.err (!%p593_p10)
}
  0x1b   :  { %s597_s22 = scalar_lea.vmem %s25_s27, 128  ;;  %p602_p12 = scmp.lt.s32.totalorder %s25_s27, %s25_s27 }
  0x1c   :  { %p598_p11 = scmp.ne.s32.totalorder %s25_s27, %s597_s22  ;;  %p603_p13 = scmp.lt.s32.totalorder %s597_s22, %s597_s22 }
  0x1e   :  { %p604_p0 = por %p603_p13, %p602_p12 }
  0x20   :  { %p605_p1 = pnand %p604_p0, %p598_p11 }
  0x22   :  { %608 = shalt.err (!%p605_p1)
}
  0x23   :  { %27 = dma.hbm_to_vmem [thread:$0]  %s914_s0, 128, %s25_s27, [#allocation3]  }
  0x24   :  { %s58_s26 = sshll.u32 %s919_s5, 4  ;;  %s699_s28 = smov [#allocation8]   ;;  %s59_s26 = int_to_ptr.vmem [resolvable:$true] %s58_s26 }
  0x25   :  { %s48_s29 = sshll.u32 %s699_s28, 4  ;;  %s609_s9 = scalar_lea.hbm %s918_s4, 128  ;;  %s49_s29 = int_to_ptr.vmem [resolvable:$true] %s48_s29 }
  0x26   :  { %p610_p2 = scmp.ne.s32.totalorder %s918_s4, %s609_s9  ;;  %p613_p3 = scmp.lt.u32.totalorder %s609_s9, %s918_s4 }
  0x28   :  { %p615_p4 = pnand %p613_p3, %p610_p2 }
  0x2a   :  { %618 = shalt.err (!%p615_p4)
}
  0x2b   :  { %s619_s0 = scalar_lea.vmem %s49_s29, 128  ;;  %p624_p6 = scmp.lt.s32.totalorder %s49_s29, %s49_s29 }
  0x2c   :  { %p620_p5 = scmp.ne.s32.totalorder %s49_s29, %s619_s0  ;;  %p625_p7 = scmp.lt.s32.totalorder %s619_s0, %s619_s0 }
  0x2e   :  { %p626_p8 = por %p625_p7, %p624_p6 }
  0x30   :  { %p627_p9 = pnand %p626_p8, %p620_p5 }
  0x32   :  { %630 = shalt.err (!%p627_p9)
}
  0x33   :  { %51 = dma.hbm_to_vmem [thread:$0]  %s918_s4, 128, %s49_s29, [#allocation7]  }
  0x34   :  { %s631_s14 = scalar_lea.vmem %s59_s26, 16  ;;  %p636_p11 = scmp.lt.s32.totalorder %s59_s26, %s59_s26 }
  0x35   :  { %p632_p10 = scmp.ne.s32.totalorder %s59_s26, %s631_s14  ;;  %p637_p12 = scmp.lt.s32.totalorder %s631_s14, %s631_s14 }
  0x37   :  { %p638_p13 = por %p637_p12, %p636_p11 }
  0x39   :  { %p639_p0 = pnand %p638_p13, %p632_p10 }
  0x3b   :  { %642 = shalt.err (!%p639_p0)
}
  0x3c   :  { %s700_s15 = smov [#allocation9]  }
  0x3d   :  { %61 = dma.vmem_to_smem %s59_s26, 16, %s700_s15, [#allocation5]  }
  0x3e   :  { %687 = dma.done.wait [#allocation3], 128  }
  0x3f   :  { %688 = vsyncadd [#allocation3], 4294967168 }
  0x40   :  { %689 = dma.done.wait [#allocation7], 256  }
  0x41   :  { %690 = vsyncadd [#allocation7], 4294967040 }
  0x42   :  { %691 = dma.done.wait [#allocation5], 16  }
  0x43   :  { %692 = vsyncadd [#allocation5], 4294967280 }
  0x44   :  { %74 = sfence }
  0x45   :  { %v355_v0 = vld [vmem:[%s915_s1] ss:$0 sm:$0xff]  ;;  %v85_v1 = vlaneseq  ;;  %v701_v2 = vmov 0.0|0.0   ;;  %v76_v3 = vld [vmem:[#allocation6] sm:$0xff]  ;;  %s98_s4 = sld [smem:[#allocation9]]  ;;  %s356_s18 = sld [smem:[#allocation9 + $0x1]] }
  0x46   :  { %488 = vmatprep.subr.bf16.mxu0 %v701_v2  ;;  %516 = vmatprep.subr.bf16.mxu1 %v701_v2  ;;  %v790_v4 = vsub.f32 %v355_v0, %v76_v3  ;;  %vm702_vm0 = vmmov 0   ;;  %v703_v7 = vmov 0.0   ;;  %s357_s1 = sld [smem:[#allocation9 + $0x2]]  ;;  %v795_v23 = vld [vmem:[#allocation2] sm:$0xff]  ;;  %vm174_vm12 = vcmask 982016   ;;  %s704_s23 = smov [#allocation10]  }
  0x47   :  { %v86_v5 = vshrl.u32 %v85_v1, 7  ;;  %452 = vmatprep.mubr.msk.f32.mxu0 %vm702_vm0, %v703_v7  ;;  %485 = vmatprep.mubr.msk.f32.mxu1 %vm702_vm0, %v703_v7  ;;  %vm93_vm2 = vcmp.eq.s32.totalorder %v795_v23, 0  ;;  %vm94_vm3 = vcmp.eq.s32.totalorder %v795_v23, 1  ;;  %vm95_vm5 = vcmp.eq.s32.totalorder %v795_v23, 2  ;;  %v173_v52 = vld [vmem:[%s917_s3] sm:$0x1f] }
  0x48   :  { %v91_v9 = vmax.f32 %v790_v4, 0.0  ;;  %vm92_vm1 = vcmp.ge.f32.partialorder %v790_v4, 0.0  ;;  %vm806_vm4 = vmpackc.low %vm94_vm3, %vm93_vm2  ;;  %vm96_vm6 = vcmp.eq.s32.totalorder %v795_v23, 3  ;;  %vm97_vm8 = vcmp.eq.s32.totalorder %v795_v23, 4  ;;  %v249_v53 = vld [vmem:[#allocation8] sm:$0x1f] }
  0x49   :  { %v87_v6 = vsub.s32 7, %v86_v5  ;;  %vm821_vm7 = vmpackc.low %vm96_vm6, %vm95_vm5  ;;  %s330_s24 = sshll.u32 %s704_s23, 4  ;;  %s705_s3 = smov [#allocation11]   ;;  %s331_s24 = int_to_ptr.vmem [resolvable:$true] %s330_s24 }
  0x4a   :  { %vm833_vm9 = vmpackc.low %vm93_vm2, %vm97_vm8  ;;  %s340_s25 = sshll.u32 %s705_s3, 4  ;;  %s643_s26 = scalar_lea.vmem %s331_s24, 128  ;;  %s341_s25 = int_to_ptr.vmem [resolvable:$true] %s340_s25 }
  0x4b   :  { %v88_v8 = vrot.slane %v76_v3, %v87_v6  ;;  %s99_s19 = ssub.f32 0.0, %s98_s4  ;;  %vm847_vm10 = vmpackc.low %vm95_vm5, %vm94_vm3  ;;  %p644_p1 = scmp.ne.s32.totalorder %s331_s24, %s643_s26 }
  0x4c   :  { %s103_s20 = ssub.f32 0.0, %s356_s18  ;;  %vm506_vm11 = vmpackc.low %vm97_vm8, %vm96_vm6  ;;  %p648_p2 = scmp.lt.s32.totalorder %s331_s24, %s331_s24 }
  0x4d   :  { %v89_v10 = vsub.f32 %v88_v8, %v76_v3  ;;  %v100_v11 = vstv %s99_s19  ;;  %s107_s21 = ssub.f32 0.0, %s357_s1  ;;  %p649_p3 = scmp.lt.s32.totalorder %s643_s26, %s643_s26 }
  0x4e   :  { %v101_v13 = vmul.f32 %v100_v11, %v91_v9  ;;  %v104_v14 = vstv %s103_s20 }
  0x4f   :  { %v90_v12 = vmax.f32 %v89_v10, 0.0  ;;  %v105_v15 = vmul.f32 %v104_v14, %v91_v9  ;;  %v108_v21 = vstv %s107_s21  ;;  %p650_p4 = por %p649_p3, %p648_p2 }
  0x50   :  { %v110_v16 = vmul.f32 1.442695, %v101_v13  ;;  %v109_v24 = vmul.f32 %v108_v21, %v91_v9 }
  0x51   :  { %v116_v17 = vmul.f32 %v100_v11, %v90_v12  ;;  %v112_v18 = vmul.f32 1.442695, %v105_v15  ;;  %v117_v19 = vmul.f32 %v104_v14, %v90_v12  ;;  %v118_v27 = vmul.f32 %v108_v21, %v90_v12  ;;  %p651_p5 = pnand %p650_p4, %p644_p1 }
  0x52   :  { %553 = vpow2.f32 %v110_v16  ;;  %v114_v26 = vmul.f32 1.442695, %v109_v24 }
  0x53   :  { %v119_v20 = vmul.f32 1.442695, %v116_v17  ;;  %555 = vpow2.f32 %v112_v18  ;;  %v121_v22 = vmul.f32 1.442695, %v117_v19  ;;  %v123_v33 = vmul.f32 1.442695, %v118_v27 }
  0x55   :  { %557 = vpow2.f32 %v119_v20 }
  0x56   :  { %559 = vpow2.f32 %v121_v22 }
  0x57   :  { %561 = vpow2.f32 %v114_v26 }
  0x58   :  { %563 = vpow2.f32 %v123_v33 }
  0x5c   :  { %v554_v25 = vpop.eup %553 }
  0x5d   :  { %v127_v28 = vsel %vm92_vm1, %v554_v25, 0.0  ;;  %v556_v30 = vpop.eup %555 }
  0x5e   :  { %v489_v31 = vpack.c.bf16 %v127_v28, %v127_v28  ;;  %v128_v34 = vsel %vm92_vm1, %v556_v30, 0.0 }
  0x5f   :  { %v558_v32 = vpop.eup %557  ;;  %v497_v38 = vpack.c.bf16 %v128_v34, %v127_v28  ;;  %v501_v42 = vpack.c.bf16 %v128_v34, %v128_v34 }
  0x60   :  { %491 = vmatpush3.bf16.msk.msra.mxu0 %vm806_vm4, %v489_v31  ;;  %v130_v36 = vsub.f32 %v558_v32, %v554_v25  ;;  %v560_v37 = vpop.eup %559 }
  0x61   :  { %492 = vmatprep.subr.bf16.mxu0 %v701_v2  ;;  %v131_v41 = vsub.f32 %v560_v37, %v556_v30  ;;  %v562_v44 = vpop.eup %561 }
  0x62   :  { %v517_v39 = vpack.c.bf16 %v130_v36, %v130_v36  ;;  %v129_v46 = vsel %vm92_vm1, %v562_v44, 0.0  ;;  %v564_v48 = vpop.eup %563 }
  0x63   :  { %v525_v45 = vpack.c.bf16 %v131_v41, %v130_v36  ;;  %v529_v47 = vpack.c.bf16 %v131_v41, %v131_v41  ;;  %v509_v49 = vpack.c.bf16 %v129_v46, %v129_v46  ;;  %v132_v50 = vsub.f32 %v564_v48, %v562_v44 }
  0x64   :  { %495 = vmatpush3.bf16.msk.msra.mxu0 %vm821_vm7, %v489_v31  ;;  %519 = vmatpush3.bf16.msk.msra.mxu1 %vm806_vm4, %v517_v39 }
  0x65   :  { %496 = vmatprep.subr.bf16.mxu0 %v701_v2  ;;  %520 = vmatprep.subr.bf16.mxu1 %v701_v2  ;;  %v537_v51 = vpack.c.bf16 %v132_v50, %v132_v50 }
  0x68   :  { %499 = vmatpush3.bf16.msk.msra.mxu0 %vm833_vm9, %v497_v38  ;;  %523 = vmatpush3.bf16.msk.msra.mxu1 %vm821_vm7, %v517_v39 }
  0x69   :  { %500 = vmatprep.subr.bf16.mxu0 %v701_v2  ;;  %524 = vmatprep.subr.bf16.mxu1 %v701_v2 }
  0x6c   :  { %503 = vmatpush3.bf16.msk.msra.mxu0 %vm847_vm10, %v501_v42  ;;  %527 = vmatpush3.bf16.msk.msra.mxu1 %vm833_vm9, %v525_v45 }
  0x6d   :  { %504 = vmatprep.subr.bf16.mxu0 %v701_v2  ;;  %528 = vmatprep.subr.bf16.mxu1 %v701_v2 }
  0x70   :  { %507 = vmatpush3.bf16.msk.msra.mxu0 %vm506_vm11, %v501_v42  ;;  %531 = vmatpush3.bf16.msk.msra.mxu1 %vm847_vm10, %v529_v47 }
  0x71   :  { %508 = vmatprep.subr.bf16.mxu0 %v701_v2  ;;  %532 = vmatprep.subr.bf16.mxu1 %v701_v2 }
  0x74   :  { %511 = vmatpush3.bf16.msk.msra.mxu0 %vm806_vm4, %v509_v49  ;;  %535 = vmatpush3.bf16.msk.msra.mxu1 %vm506_vm11, %v529_v47 }
  0x75   :  { %512 = vmatprep.subr.bf16.mxu0 %v701_v2  ;;  %536 = vmatprep.subr.bf16.mxu1 %v701_v2 }
  0x78   :  { %515 = vmatpush3.bf16.msk.msra.mxu0 %vm821_vm7, %v509_v49  ;;  %539 = vmatpush3.bf16.msk.msra.mxu1 %vm806_vm4, %v537_v51 }
  0x79   :  { %450 = vmatprep.subr.mxu0 %v703_v7  ;;  %540 = vmatprep.subr.bf16.mxu1 %v701_v2 }
  0x7c   :  { %451 = vmatpush3.msk.msra.mxu0 %vm97_vm8, %v129_v46  ;;  %543 = vmatpush3.bf16.msk.msra.mxu1 %vm821_vm7, %v537_v51 }
  0x7d   :  { %453 = vmatmul.mubr.msk.f32.vlgmr.msra.gmra.mrb[0].mxu0 %vm174_vm12, %v173_v52  ;;  %483 = vmatprep.subr.mxu1 %v703_v7 }
  0x80   :  { %484 = vmatpush3.msk.msra.mxu1 %vm97_vm8, %v132_v50 }
  0x81   :  { %486 = vmatmul.mubr.msk.f32.vlgmr.msra.gmra.mrb[0].mxu1 %vm174_vm12, %v249_v53 }
 0x150   :  { %v244_v54 = vpop.f32.mrb[0].mxu0 }
 0x151   :  { %248 = vst [vmem:[#allocation10] sm:$0x1f] %v244_v54  ;;  %v454_v55 = vpop.f32.mrb[1].mxu0 }
 0x152   :  { %654 = shalt.err (!%p651_p5)
}
 0x153   :  { %s655_s30 = scalar_lea.hbm %s920_s6, 128 }
 0x154   :  { %p656_p6 = scmp.ne.s32.totalorder %s920_s6, %s655_s30  ;;  %p659_p7 = scmp.lt.u32.totalorder %s655_s30, %s920_s6 }
 0x156   :  { %p661_p8 = pnand %p659_p7, %p656_p6 }
 0x158   :  { %664 = shalt.err (!%p661_p8)
}
 0x159   :  { %333 = dma.vmem_to_hbm [thread:$0]  %s331_s24, 128, %s920_s6, [#allocation4]   ;;  %v319_v56 = vpop.f32.mrb[0].mxu1 }
 0x15a   :  { %323 = vst [vmem:[#allocation11] sm:$0x1f] %v319_v56  ;;  %v487_v57 = vpop.f32.mrb[1].mxu1  ;;  %s665_s0 = scalar_lea.vmem %s341_s25, 128  ;;  %p670_p10 = scmp.lt.s32.totalorder %s341_s25, %s341_s25 }
 0x15b   :  { %p666_p9 = scmp.ne.s32.totalorder %s341_s25, %s665_s0  ;;  %p671_p11 = scmp.lt.s32.totalorder %s665_s0, %s665_s0 }
 0x15d   :  { %p672_p12 = por %p671_p11, %p670_p10 }
 0x15f   :  { %p673_p13 = pnand %p672_p12, %p666_p9 }
 0x161   :  { %676 = shalt.err (!%p673_p13)
}
 0x162   :  { %s677_s14 = scalar_lea.hbm %s921_s7, 128 }
 0x163   :  { %p678_p0 = scmp.ne.s32.totalorder %s921_s7, %s677_s14  ;;  %p681_p1 = scmp.lt.u32.totalorder %s677_s14, %s921_s7 }
 0x165   :  { %p683_p2 = pnand %p681_p1, %p678_p0 }
 0x167   :  { %686 = shalt.err (!%p683_p2)
}
 0x168   :  { %343 = dma.vmem_to_hbm [thread:$0]  %s341_s25, 128, %s921_s7, [#allocation12]  }
 0x169   :  { %693 = dma.done.wait [#allocation4], 128  }
 0x16a   :  { %694 = vsyncadd [#allocation4], 4294967168 }
 0x16b   :  { %695 = dma.done.wait [#allocation12], 128  }
 0x16c   :  { %696 = vsyncadd [#allocation12], 4294967168 }
 0x16d   :  { %350 = vsyncpa [#allocation3], 1 }
 0x16e   :  { %351 = vsyncpa [#allocation7], 1 }
 0x16f   :  { %352 = vsyncpa [#allocation4], 1 }
 0x170   :  { %353 = vsyncpa [#allocation12], 1 }
 0x171   :  { %354 = vsyncpa [#allocation5], 1 }

</bundles_post_ra>
